<compile_context>
chip_gen: v7x
topology: tpu7x:2x2x1
jax: 0.10.0
libtpu: 0.0.40
codegen_flags: <defaults>
</compile_context>

<pallas_src>
import math

import jax
import jax.numpy as jnp
from jax.experimental import pallas as pl
from jax.experimental.pallas import tpu as pltpu

_LANE = 128
_SUBLANE = 8
_TILE_TARGET_BYTES = 1 << 20  # ~1 MiB/tile; (in+out) x double-buffer ~= 4 MiB VMEM


def _identity_copy_kernel(x_ref, o_ref):
    # The only "compute" SqueezeLayer performs on values: identity.
    o_ref[...] = x_ref[...]


def _squeezed_shape(shape, dims):
    """Sequential torch-style squeeze over negative dims; validates like the module."""
    for d in dims:
        if d >= 0:
            raise RuntimeError("dims must all be < 0")
    shape = list(shape)
    for d in dims:
        if shape[d] != 1:
            raise RuntimeError(
                f"Tried to squeeze an input over dims {dims} with shape {tuple(shape)}"
            )
        del shape[len(shape) + d]  # negative index into the *current* shape
    return tuple(shape)


def _pallas_identity_copy(x: jax.Array) -> jax.Array:
    """Materialize a copy of `x` with a tiled, lane-dense Pallas identity kernel."""
    total = math.prod(x.shape)
    itemsize = jnp.dtype(x.dtype).itemsize

    if total == 0:
        return x  # degenerate: nothing to copy

    if total % _LANE != 0:
        # Small/ragged fallback: full-array single block (exempt from the (8,128)
        # divisibility rule). Intended only for small tensors.
        # TODO(synk): pad-to-128 tiling for large tensors whose size is not a
        # multiple of 128 (masked stores / extra pad-slice traffic otherwise).
        x2d = x.reshape((1, total))
        out = pl.pallas_call(
            _identity_copy_kernel,
            out_shape=jax.ShapeDtypeStruct((1, total), x.dtype),
            in_specs=[pl.BlockSpec((1, total), lambda: (0, 0))],
            out_specs=pl.BlockSpec((1, total), lambda: (0, 0)),
            input_output_aliases={0: 0},
        )(x2d)
        return out.reshape(x.shape)

    # Lane-dense slab: grow the lane dim to a large multiple of 128 that divides
    # the element count (full vregs, unmasked vst).
    lanes = _LANE
    while total % (lanes * 2) == 0 and lanes * 2 <= 8 * _LANE:
        lanes *= 2
    rows = total // lanes

    if rows <= _SUBLANE:
        tile_rows = rows  # block == full array dims -> divisibility exemption
    else:
        tile_rows = max(
            _SUBLANE,
            (_TILE_TARGET_BYTES // (lanes * itemsize)) // _SUBLANE * _SUBLANE,
        )
        tile_rows = min(tile_rows, (rows // _SUBLANE) * _SUBLANE)

    grid = (pl.cdiv(rows, tile_rows),)
    x2d = x.reshape((rows, lanes))

    out = pl.pallas_call(
        _identity_copy_kernel,
        out_shape=jax.ShapeDtypeStruct((rows, lanes), x.dtype),
        grid=grid,
        in_specs=[pl.BlockSpec((tile_rows, lanes), lambda i: (i, 0))],
        out_specs=pl.BlockSpec((tile_rows, lanes), lambda i: (i, 0)),
        input_output_aliases={0: 0},  # donate input slab; no 2nd HBM allocation
        compiler_params=pltpu.CompilerParams(
            dimension_semantics=("parallel",),  # shard copy across v7x's 2 TCs
        ),
        cost_estimate=pl.CostEstimate(
            flops=0, transcendentals=0, bytes_accessed=2 * total * itemsize
        ),
    )(x2d)
    return out.reshape(x.shape)


def squeeze_layer(x: jax.Array, dims=(-1,), materialize: bool = False) -> jax.Array:
    """Pallas-backed equivalent of torchrl SqueezeLayer.forward.

    Default (materialize=False): metadata-only reshape -- zero HBM traffic,
    which is the correct cost model for a squeeze. materialize=True routes the
    data through the tiled Pallas identity-copy kernel (for benchmarking or
    when a fresh buffer is explicitly required).
    """
    out_shape = _squeezed_shape(x.shape, dims)
    if not materialize:
        return x.reshape(out_shape)
    return _pallas_identity_copy(x).reshape(out_shape)


if __name__ == "__main__":
    key = jax.random.PRNGKey(0)
    B, C, H = 2, 4, 16
    x = jax.random.normal(key, (B, C, H, 1), dtype=jnp.float32)

    ref = jnp.squeeze(x, axis=-1)

    # Fast (default) path: metadata-only.
    y_fast = jax.block_until_ready(squeeze_layer(x, dims=(-1,)))
    assert y_fast.shape == (B, C, H)
    assert bool(jnp.all(y_fast == ref))

    # Pallas-materialized path: tiled, lane-dense identity copy.
    y = jax.block_until_ready(squeeze_layer(x, dims=(-1,), materialize=True))
    assert y.shape == (B, C, H), y.shape
    assert y.dtype == x.dtype
    assert bool(jnp.all(y == ref))

    # Multi-dim squeeze with torch's *sequential* negative-dim semantics:
    # (B, C, 1, H, 1) --squeeze(-1)--> (B, C, 1, H) --squeeze(-2)--> (B, C, H)
    x2 = jax.random.normal(jax.random.PRNGKey(1), (B, C, 1, H, 1), dtype=jnp.float32)
    ref2 = jnp.squeeze(jnp.squeeze(x2, axis=-1), axis=-2)
    y2 = jax.block_until_ready(squeeze_layer(x2, dims=(-1, -2), materialize=True))
    assert y2.shape == ref2.shape == (B, C, H)
    assert bool(jnp.all(y2 == ref2))

    print("KERNEL_OK")
</pallas_src>

<mosaic_0001>
module attributes {stable_mosaic.version = 11 : i64} {
  func.func @_identity_copy_kernel(%arg0: i32, %arg1: memref<1x128xf32, #tpu.memory_space<vmem>>, %arg2: memref<1x128xf32, #tpu.memory_space<vmem>>) attributes {dimension_semantics = [#tpu.dimension_semantics<parallel>], iteration_bounds = array<i64: 1>, scalar_prefetch = 0 : i64, scratch_operands = 0 : i64, tpu.core_type = #tpu.core_type<tc>, window_params = [{transform_indices = @transform_0, window_bounds = array<i64: 1, 128>}, {transform_indices = @transform_1, window_bounds = array<i64: 1, 128>}]} {
    %c0 = arith.constant 0 : index
    %c0_0 = arith.constant 0 : index
    %0 = vector.load %arg1[%c0, %c0_0] : memref<1x128xf32, #tpu.memory_space<vmem>>, vector<1x128xf32>
    %c0_1 = arith.constant 0 : index
    %c0_2 = arith.constant 0 : index
    %1 = vector.load %arg2[%c0_1, %c0_2] : memref<1x128xf32, #tpu.memory_space<vmem>>, vector<1x128xf32>
    tpu.vector_store %arg2[%c0_1, %c0_2], %0 {strides = array<i32>} : memref<1x128xf32, #tpu.memory_space<vmem>>, vector<1x128xf32>,
    return
  }
  func.func @transform_0(%arg0: i32) -> (i32, i32) {
    %c0_i32 = arith.constant 0 : i32
    %c0_i32_0 = arith.constant 0 : i32
    return %arg0, %c0_i32 : i32, i32
  }
  func.func @transform_1(%arg0: i32) -> (i32, i32) {
    %c0_i32 = arith.constant 0 : i32
    %c0_i32_0 = arith.constant 0 : i32
    return %arg0, %c0_i32 : i32, i32
  }
}

</mosaic_0001>

<bundles_post_ra>
// kernel: tpu_custom_call.1
= control target key start
LH: loop header
LB: loop body
LE: loop exit
PB: predicated region body
PF: predicated region fallthrough
CT: control target
= control target key end

     0   :  { %6 = vsyncpa [#allocation3], 0  ;;  %s124_s0 = inlined_call_operand.hbm [shape: f32[1,128], index: 0, kind: input, shape index: {}, may-alias: {0,1}]   ;;  %s125_s1 = inlined_call_operand.hbm [shape: f32[1,128], index: 1, kind: output, shape index: {}, may-alias: {0,1}]  }
   0x1   :  { %7 = vsyncpa [#allocation4], 0  ;;  %s88_s6 = smov [#allocation2]   ;;  %s40_s10 = scalar_lea.hbm %s124_s0, 16 }
   0x2   :  { %s14_s7 = sshll.u32 %s88_s6, 4  ;;  %p41_p0 = scmp.ne.s32.totalorder %s124_s0, %s40_s10  ;;  %s15_s7 = int_to_ptr.vmem [resolvable:$true] %s14_s7 }
   0x3   :  { %p44_p1 = scmp.lt.u32.totalorder %s40_s10, %s124_s0 }
   0x5   :  { %p46_p2 = pnand %p44_p1, %p41_p0 }
   0x7   :  { %49 = shalt.err (!%p46_p2)
}
   0x8   :  { %s50_s15 = scalar_lea.vmem %s15_s7, 16  ;;  %s54_s16 = scalar_lea.vmem %s15_s7, 32 }
   0x9   :  { %p51_p3 = scmp.ne.s32.totalorder %s15_s7, %s50_s15  ;;  %p55_p4 = scmp.lt.s32.totalorder %s15_s7, %s15_s7 }
   0xa   :  { %p56_p5 = scmp.lt.s32.totalorder %s54_s16, %s50_s15 }
   0xc   :  { %p57_p6 = por %p56_p5, %p55_p4 }
   0xe   :  { %p58_p7 = pnand %p57_p6, %p51_p3 }
  0x10   :  { %61 = shalt.err (!%p58_p7)
}
  0x11   :  { %17 = dma.hbm_to_vmem [thread:$0]  %s124_s0, 16, %s15_s7, [#allocation3]  }
  0x12   :  { %84 = dma.done.wait [#allocation3], 16  }
  0x13   :  { %85 = vsyncadd [#allocation3], 4294967280  ;;  %s89_s19 = smov [#allocation5]   ;;  %v21_v0 = vld [vmem:[#allocation2] sm:$0x1] }
  0x14   :  { %s29_s20 = sshll.u32 %s89_s19, 4  ;;  %22 = vst [vmem:[#allocation5] sm:$0x1] %v21_v0  ;;  %s30_s20 = int_to_ptr.vmem [resolvable:$true] %s29_s20 }
  0x15   :  { %s62_s21 = scalar_lea.vmem %s30_s20, 16  ;;  %s66_s22 = scalar_lea.vmem %s30_s20, 32 }
  0x16   :  { %p63_p8 = scmp.ne.s32.totalorder %s30_s20, %s62_s21  ;;  %p67_p9 = scmp.lt.s32.totalorder %s30_s20, %s30_s20 }
  0x17   :  { %p68_p10 = scmp.lt.s32.totalorder %s66_s22, %s62_s21 }
  0x19   :  { %p69_p11 = por %p68_p10, %p67_p9 }
  0x1b   :  { %p70_p12 = pnand %p69_p11, %p63_p8 }
  0x1d   :  { %73 = shalt.err (!%p70_p12)
}
  0x1e   :  { %s74_s25 = scalar_lea.hbm %s125_s1, 16 }
  0x1f   :  { %p75_p13 = scmp.ne.s32.totalorder %s125_s1, %s74_s25  ;;  %p78_p0 = scmp.lt.u32.totalorder %s74_s25, %s125_s1 }
  0x21   :  { %p80_p1 = pnand %p78_p0, %p75_p13 }
  0x23   :  { %83 = shalt.err (!%p80_p1)
}
  0x24   :  { %32 = dma.vmem_to_hbm [thread:$0]  %s30_s20, 16, %s125_s1, [#allocation4]  }
  0x25   :  { %86 = dma.done.wait [#allocation4], 16  }
  0x26   :  { %87 = vsyncadd [#allocation4], 4294967280 }
  0x27   :  { %36 = vsyncpa [#allocation3], 1 }
  0x28   :  { %37 = vsyncpa [#allocation4], 1 }

</bundles_post_ra>
